<compile_context>
chip_gen: v6e
topology: v6e:2x2x1
jax: 0.10.0
libtpu: 0.0.40
codegen_flags: <defaults>
</compile_context>

<pallas_src>
import jax
import jax.numpy as jnp
from jax.experimental import pallas as pl
from jax.experimental.pallas import tpu as pltpu


def mlp_kernel(x_ref, w1_ref, b1_ref, w2_ref, b2_ref, w3_ref, b3_ref, o_ref):
    # Entire 3-layer MLP for one (packed) batch tile, fused in VMEM.
    x = x_ref[...]                                                   # bf16 [bm, G*in]
    h = jnp.dot(x, w1_ref[...], preferred_element_type=jnp.float32)  # f32 acc
    h = jnp.maximum(h + b1_ref[...], 0.0)
    h = jnp.dot(h.astype(w2_ref.dtype), w2_ref[...],
                preferred_element_type=jnp.float32)
    h = jnp.maximum(h + b2_ref[...], 0.0)
    out = jnp.dot(h.astype(w3_ref.dtype), w3_ref[...],
                  preferred_element_type=jnp.float32) + b3_ref[...]
    o_ref[...] = out.astype(o_ref.dtype)                             # lane-dense store


def net_forward(x, params, *, bm=4096, group=16, stream_dtype=jnp.bfloat16):
    """Forward pass of Net.

    x: [B, input_size] float32.
    params: dict of PyTorch-shaped weights (w: [out, in], b: [out]).
    bm: target original batch rows per grid step (rounded internally).
    group: batch rows packed per lane-row (16 makes out_size=8 lane-dense).
    """
    B, in_size = x.shape
    hidden = params["w1"].shape[0]          # 16
    out_size = params["w3"].shape[0]
    G = group

    in_p, hid_p, out_p = G * in_size, G * hidden, G * out_size

    # --- packed-batch geometry: pad B so it reshapes cleanly into tiles ---
    Bp = pl.cdiv(B, G)                       # packed rows needed
    Bp = ((Bp + 7) // 8) * 8                 # sublane-align packed rows
    bm_p = max(8, min(((bm // G + 7) // 8) * 8, Bp))   # packed rows per step
    num_tiles = pl.cdiv(Bp, bm_p)
    Bp = num_tiles * bm_p
    B_pad = Bp * G

    xp = x if B_pad == B else jnp.pad(x, ((0, B_pad - B), (0, 0)))
    xp = xp.reshape(Bp, in_p).astype(stream_dtype)     # lane-dense input slab

    # --- block-diagonal weights (kron) + tiled biases, built once in XLA ---
    eye = jnp.eye(G, dtype=jnp.float32)
    w1 = jnp.kron(eye, params["w1"].T.astype(jnp.float32)).astype(stream_dtype)
    w2 = jnp.kron(eye, params["w2"].T.astype(jnp.float32)).astype(stream_dtype)
    w3 = jnp.kron(eye, params["w3"].T.astype(jnp.float32)).astype(stream_dtype)
    b1 = jnp.tile(params["b1"].astype(jnp.float32), G).reshape(1, hid_p)
    b2 = jnp.tile(params["b2"].astype(jnp.float32), G).reshape(1, hid_p)
    b3 = jnp.tile(params["b3"].astype(jnp.float32), G).reshape(1, out_p)

    def full(arr):
        # Constant block index across the grid -> fetched once, stays in VMEM.
        return pl.BlockSpec(arr.shape, lambda i: (0, 0))

    out_packed = pl.pallas_call(
        mlp_kernel,
        out_shape=jax.ShapeDtypeStruct((Bp, out_p), jnp.float32),
        grid_spec=pltpu.PrefetchScalarGridSpec(
            num_scalar_prefetch=0,
            grid=(num_tiles,),
            in_specs=[
                pl.BlockSpec((bm_p, in_p), lambda i: (i, 0)),   # x tile
                full(w1), full(b1),
                full(w2), full(b2),
                full(w3), full(b3),
            ],
            out_specs=pl.BlockSpec((bm_p, out_p), lambda i: (i, 0)),
        ),
        compiler_params=pltpu.CompilerParams(
            dimension_semantics=("parallel",)),
    )(xp, w1, b1, w2, b2, w3, b3)

    # Free row-major view back to [B, out_size]; drop padded rows.
    return out_packed.reshape(B_pad, out_size)[:B]


def init_params(key, input_size, output_size, hidden=16):
    """Deterministic init mimicking nn.Linear's uniform(-1/sqrt(fan_in), 1/sqrt(fan_in))."""
    ks = jax.random.split(key, 6)

    def linear(kw, kb, fan_in, fan_out):
        bound = 1.0 / jnp.sqrt(fan_in)
        w = jax.random.uniform(kw, (fan_out, fan_in), jnp.float32, -bound, bound)
        b = jax.random.uniform(kb, (fan_out,), jnp.float32, -bound, bound)
        return w, b

    w1, b1 = linear(ks[0], ks[1], input_size, hidden)
    w2, b2 = linear(ks[2], ks[3], hidden, hidden)
    w3, b3 = linear(ks[4], ks[5], hidden, output_size)
    return dict(w1=w1, b1=b1, w2=w2, b2=b2, w3=w3, b3=b3)


def reference_forward(x, p):
    h1 = jnp.maximum(x @ p["w1"].T + p["b1"], 0.0)
    h2 = jnp.maximum(h1 @ p["w2"].T + p["b2"], 0.0)
    return h2 @ p["w3"].T + p["b3"]


if __name__ == "__main__":
    key = jax.random.PRNGKey(0)
    kx, kp = jax.random.split(key)

    batch, input_size, output_size = 16, 32, 8
    x = jax.random.normal(kx, (batch, input_size), jnp.float32)
    params = init_params(kp, input_size, output_size)

    out = net_forward(x, params)          # bf16-streamed, single grid step
    out = jax.block_until_ready(out)

    ref = reference_forward(x, params)    # f32 reference
    assert out.shape == (batch, output_size)
    # bf16 streaming of x / weights / intermediates => loosened tolerance.
    assert jnp.allclose(out, ref, atol=5e-2, rtol=5e-2), "mismatch vs JAX reference"

    print("KERNEL_OK")
</pallas_src>

<mosaic_0001>
module attributes {stable_mosaic.version = 11 : i64} {
  func.func @mlp_kernel(%arg0: i32, %arg1: memref<8x512xbf16, #tpu.memory_space<vmem>>, %arg2: memref<512x256xbf16, #tpu.memory_space<vmem>>, %arg3: memref<1x256xf32, #tpu.memory_space<vmem>>, %arg4: memref<256x256xbf16, #tpu.memory_space<vmem>>, %arg5: memref<1x256xf32, #tpu.memory_space<vmem>>, %arg6: memref<256x128xbf16, #tpu.memory_space<vmem>>, %arg7: memref<1x128xf32, #tpu.memory_space<vmem>>, %arg8: memref<8x128xf32, #tpu.memory_space<vmem>>) attributes {dimension_semantics = [#tpu.dimension_semantics<parallel>], iteration_bounds = array<i64: 1>, scalar_prefetch = 0 : i64, scratch_operands = 0 : i64, tpu.core_type = #tpu.core_type<tc>, window_params = [{transform_indices = @transform_0, window_bounds = array<i64: 8, 512>}, {pipeline_mode = #tpu.pipeline_mode<synchronous>, transform_indices = @transform_1, window_bounds = array<i64: 512, 256>}, {pipeline_mode = #tpu.pipeline_mode<synchronous>, transform_indices = @transform_2, window_bounds = array<i64: 1, 256>}, {pipeline_mode = #tpu.pipeline_mode<synchronous>, transform_indices = @transform_3, window_bounds = array<i64: 256, 256>}, {pipeline_mode = #tpu.pipeline_mode<synchronous>, transform_indices = @transform_4, window_bounds = array<i64: 1, 256>}, {pipeline_mode = #tpu.pipeline_mode<synchronous>, transform_indices = @transform_5, window_bounds = array<i64: 256, 128>}, {pipeline_mode = #tpu.pipeline_mode<synchronous>, transform_indices = @transform_6, window_bounds = array<i64: 1, 128>}, {transform_indices = @transform_7, window_bounds = array<i64: 8, 128>}]} {
    %c0 = arith.constant 0 : index
    %c0_0 = arith.constant 0 : index
    %0 = vector.load %arg1[%c0, %c0_0] : memref<8x512xbf16, #tpu.memory_space<vmem>>, vector<8x512xbf16>
    %c0_1 = arith.constant 0 : index
    %c0_2 = arith.constant 0 : index
    %1 = vector.load %arg2[%c0_1, %c0_2] : memref<512x256xbf16, #tpu.memory_space<vmem>>, vector<512x256xbf16>
    %cst = arith.constant dense<0.000000e+00> : vector<8x256xf32>
    %2 = tpu.matmul %0, %1, %cst {dimension_numbers = #tpu.dot_dimension_numbers<[1], [0], [0], [1], [0, 0, 1, 1], [], []>} : vector<8x512xbf16>, vector<512x256xbf16>, vector<8x256xf32> -> vector<8x256xf32>
    %c0_3 = arith.constant 0 : index
    %c0_4 = arith.constant 0 : index
    %3 = vector.load %arg3[%c0_3, %c0_4] : memref<1x256xf32, #tpu.memory_space<vmem>>, vector<1x256xf32>
    %4 = vector.broadcast %3 : vector<1x256xf32> to vector<8x256xf32>
    %5 = arith.addf %2, %4 : vector<8x256xf32>
    %cst_5 = arith.constant 0.000000e+00 : f32
    %6 = vector.broadcast %cst_5 : f32 to vector<8x256xf32>
    %7 = arith.maximumf %5, %6 : vector<8x256xf32>
    %8 = arith.truncf %7 : vector<8x256xf32> to vector<8x256xbf16>
    %c0_6 = arith.constant 0 : index
    %c0_7 = arith.constant 0 : index
    %9 = vector.load %arg4[%c0_6, %c0_7] : memref<256x256xbf16, #tpu.memory_space<vmem>>, vector<256x256xbf16>
    %cst_8 = arith.constant dense<0.000000e+00> : vector<8x256xf32>
    %10 = tpu.matmul %8, %9, %cst_8 {dimension_numbers = #tpu.dot_dimension_numbers<[1], [0], [0], [1], [0, 0, 1, 1], [], []>} : vector<8x256xbf16>, vector<256x256xbf16>, vector<8x256xf32> -> vector<8x256xf32>
    %c0_9 = arith.constant 0 : index
    %c0_10 = arith.constant 0 : index
    %11 = vector.load %arg5[%c0_9, %c0_10] : memref<1x256xf32, #tpu.memory_space<vmem>>, vector<1x256xf32>
    %12 = vector.broadcast %11 : vector<1x256xf32> to vector<8x256xf32>
    %13 = arith.addf %10, %12 : vector<8x256xf32>
    %cst_11 = arith.constant 0.000000e+00 : f32
    %14 = vector.broadcast %cst_11 : f32 to vector<8x256xf32>
    %15 = arith.maximumf %13, %14 : vector<8x256xf32>
    %16 = arith.truncf %15 : vector<8x256xf32> to vector<8x256xbf16>
    %c0_12 = arith.constant 0 : index
    %c0_13 = arith.constant 0 : index
    %17 = vector.load %arg6[%c0_12, %c0_13] : memref<256x128xbf16, #tpu.memory_space<vmem>>, vector<256x128xbf16>
    %cst_14 = arith.constant dense<0.000000e+00> : vector<8x128xf32>
    %18 = tpu.matmul %16, %17, %cst_14 {dimension_numbers = #tpu.dot_dimension_numbers<[1], [0], [0], [1], [0, 0, 1, 1], [], []>} : vector<8x256xbf16>, vector<256x128xbf16>, vector<8x128xf32> -> vector<8x128xf32>
    %c0_15 = arith.constant 0 : index
    %c0_16 = arith.constant 0 : index
    %19 = vector.load %arg7[%c0_15, %c0_16] : memref<1x128xf32, #tpu.memory_space<vmem>>, vector<1x128xf32>
    %20 = vector.broadcast %19 : vector<1x128xf32> to vector<8x128xf32>
    %21 = arith.addf %18, %20 : vector<8x128xf32>
    %c0_17 = arith.constant 0 : index
    %c0_18 = arith.constant 0 : index
    %22 = vector.load %arg8[%c0_17, %c0_18] : memref<8x128xf32, #tpu.memory_space<vmem>>, vector<8x128xf32>
    tpu.vector_store %arg8[%c0_17, %c0_18], %21 {strides = array<i32>} : memref<8x128xf32, #tpu.memory_space<vmem>>, vector<8x128xf32>,
    return
  }
  func.func @transform_0(%arg0: i32) -> (i32, i32) {
    %c0_i32 = arith.constant 0 : i32
    %c0_i32_0 = arith.constant 0 : i32
    return %arg0, %c0_i32 : i32, i32
  }
  func.func @transform_1(%arg0: i32) -> (i32, i32) {
    %c0_i32 = arith.constant 0 : i32
    %c0_i32_0 = arith.constant 0 : i32
    %c0_i32_1 = arith.constant 0 : i32
    return %c0_i32, %c0_i32_0 : i32, i32
  }
  func.func @transform_2(%arg0: i32) -> (i32, i32) {
    %c0_i32 = arith.constant 0 : i32
    %c0_i32_0 = arith.constant 0 : i32
    %c0_i32_1 = arith.constant 0 : i32
    return %c0_i32, %c0_i32_0 : i32, i32
  }
  func.func @transform_3(%arg0: i32) -> (i32, i32) {
    %c0_i32 = arith.constant 0 : i32
    %c0_i32_0 = arith.constant 0 : i32
    %c0_i32_1 = arith.constant 0 : i32
    return %c0_i32, %c0_i32_0 : i32, i32
  }
  func.func @transform_4(%arg0: i32) -> (i32, i32) {
    %c0_i32 = arith.constant 0 : i32
    %c0_i32_0 = arith.constant 0 : i32
    %c0_i32_1 = arith.constant 0 : i32
    return %c0_i32, %c0_i32_0 : i32, i32
  }
  func.func @transform_5(%arg0: i32) -> (i32, i32) {
    %c0_i32 = arith.constant 0 : i32
    %c0_i32_0 = arith.constant 0 : i32
    %c0_i32_1 = arith.constant 0 : i32
    return %c0_i32, %c0_i32_0 : i32, i32
  }
  func.func @transform_6(%arg0: i32) -> (i32, i32) {
    %c0_i32 = arith.constant 0 : i32
    %c0_i32_0 = arith.constant 0 : i32
    %c0_i32_1 = arith.constant 0 : i32
    return %c0_i32, %c0_i32_0 : i32, i32
  }
  func.func @transform_7(%arg0: i32) -> (i32, i32) {
    %c0_i32 = arith.constant 0 : i32
    %c0_i32_0 = arith.constant 0 : i32
    return %arg0, %c0_i32 : i32, i32
  }
}

</mosaic_0001>

<bundles_post_ra>
// kernel: tpu_custom_call.1
= control target key start
LH: loop header
LB: loop body
LE: loop exit
PB: predicated region body
PF: predicated region fallthrough
CT: control target
= control target key end

     0   :  { %12 = vsyncpa [#allocation3], 0  ;;  %s1514_s0 = inlined_call_operand.hbm [shape: bf16[8,512], index: 0, kind: input, shape index: {}]   ;;  %s1515_s1 = inlined_call_operand.hbm [shape: bf16[512,256], index: 1, kind: input, shape index: {}]   ;;  %s1516_s2 = inlined_call_operand.vmem [shape: f32[1,256], index: 2, kind: input, shape index: {}]   ;;  %s1517_s3 = inlined_call_operand.hbm [shape: bf16[256,256], index: 3, kind: input, shape index: {}]   ;;  %s1518_s4 = inlined_call_operand.vmem [shape: f32[1,256], index: 4, kind: input, shape index: {}]   ;;  %s1519_s5 = inlined_call_operand.hbm [shape: bf16[256,128], index: 5, kind: input, shape index: {}]   ;;  %s1520_s6 = inlined_call_operand.vmem [shape: f32[1,128], index: 6, kind: input, shape index: {}]   ;;  %s1521_s7 = inlined_call_operand.hbm [shape: f32[8,128], index: 7, kind: output, shape index: {}]  }
   0x1   :  { %13 = vsyncpa [#allocation6], 0 }
   0x2   :  { %14 = vsyncpa [#allocation9], 0 }
   0x3   :  { %15 = vsyncpa [#allocation4], 0  ;;  %s1441_s24 = smov [#allocation5]  }
   0x4   :  { %s31_s25 = sshll.u32 %s1441_s24, 4  ;;  %s32_s25 = int_to_ptr.vmem [resolvable:$true] %s31_s25 }
   0x5   :  { %s1341_s26 = scalar_lea.vmem %s32_s25, 8192  ;;  %p1346_p1 = scmp.lt.s32.totalorder %s32_s25, %s32_s25 }
   0x6   :  { %p1342_p0 = scmp.ne.s32.totalorder %s32_s25, %s1341_s26  ;;  %p1347_p2 = scmp.lt.s32.totalorder %s1341_s26, %s1341_s26 }
   0x8   :  { %p1348_p3 = por %p1347_p2, %p1346_p1 }
   0xa   :  { %p1349_p4 = pnand %p1348_p3, %p1342_p0 }
   0xc   :  { %1352 = shalt.err (!%p1349_p4)
}
   0xd   :  { %s1442_s27 = smov 128   ;;  %s1443_s28 = smov 8  }
   0xe   :  { %37 = dma.hbm_to_vmem [thread:$0]  %s1515_s1, 8192, %s32_s25, [#allocation6], %s1442_s27, %s1442_s27, %s1443_s28  }
   0xf   :  { %s1444_s8 = smov [#allocation2]   ;;  %s1445_s10 = smov [#allocation7]  }
  0x10   :  { %s22_s9 = sshll.u32 %s1444_s8, 4  ;;  %s45_s11 = sshll.u32 %s1445_s10, 4  ;;  %s23_s9 = int_to_ptr.vmem [resolvable:$true] %s22_s9  ;;  %s46_s11 = int_to_ptr.vmem [resolvable:$true] %s45_s11 }
  0x11   :  { %s1361_s12 = scalar_lea.vmem %s23_s9, 256  ;;  %p1366_p6 = scmp.lt.s32.totalorder %s23_s9, %s23_s9 }
  0x12   :  { %p1362_p5 = scmp.ne.s32.totalorder %s23_s9, %s1361_s12  ;;  %p1367_p7 = scmp.lt.s32.totalorder %s1361_s12, %s1361_s12 }
  0x14   :  { %p1368_p8 = por %p1367_p7, %p1366_p6 }
  0x16   :  { %p1369_p9 = pnand %p1368_p8, %p1362_p5 }
  0x18   :  { %1372 = shalt.err (!%p1369_p9)
}
  0x19   :  { %25 = dma.hbm_to_vmem [thread:$0]  %s1514_s0, 256, %s23_s9, [#allocation3]  }
  0x1a   :  { %s1381_s15 = scalar_lea.vmem %s46_s11, 4096  ;;  %p1386_p11 = scmp.lt.s32.totalorder %s46_s11, %s46_s11 }
  0x1b   :  { %p1382_p10 = scmp.ne.s32.totalorder %s46_s11, %s1381_s15  ;;  %p1387_p12 = scmp.lt.s32.totalorder %s1381_s15, %s1381_s15 }
  0x1d   :  { %p1388_p13 = por %p1387_p12, %p1386_p11 }
  0x1f   :  { %p1389_p0 = pnand %p1388_p13, %p1382_p10 }
  0x21   :  { %1392 = shalt.err (!%p1389_p0)
}
  0x22   :  { %51 = dma.hbm_to_vmem [thread:$0]  %s1517_s3, 4096, %s46_s11, [#allocation6], %s1442_s27, %s1442_s27, %s1443_s28  }
  0x23   :  { %s1446_s17 = smov [#allocation8]  }
  0x24   :  { %s59_s18 = sshll.u32 %s1446_s17, 4  ;;  %s60_s18 = int_to_ptr.vmem [resolvable:$true] %s59_s18 }
  0x25   :  { %s1401_s19 = scalar_lea.vmem %s60_s18, 2048  ;;  %p1406_p2 = scmp.lt.s32.totalorder %s60_s18, %s60_s18 }
  0x26   :  { %p1402_p1 = scmp.ne.s32.totalorder %s60_s18, %s1401_s19  ;;  %p1407_p3 = scmp.lt.s32.totalorder %s1401_s19, %s1401_s19 }
  0x28   :  { %p1408_p4 = por %p1407_p3, %p1406_p2 }
  0x2a   :  { %p1409_p5 = pnand %p1408_p4, %p1402_p1 }
  0x2c   :  { %1412 = shalt.err (!%p1409_p5)
}
  0x2d   :  { %s1447_s0 = smov 64   ;;  %s1448_s20 = smov 4  }
  0x2e   :  { %65 = dma.hbm_to_vmem [thread:$0]  %s1519_s5, 2048, %s60_s18, [#allocation9], %s1447_s0, %s1447_s0, %s1448_s20  }
  0x2f   :  { %1433 = dma.done.wait [#allocation3], 256  }
  0x30   :  { %1434 = vsyncadd [#allocation3], 4294967040 }
  0x31   :  { %1435 = dma.done.wait [#allocation6], 12288  }
  0x32   :  { %1436 = vsyncadd [#allocation6], 4294955008 }
  0x33   :  { %1437 = dma.done.wait [#allocation9], 2048  }
  0x34   :  { %1438 = vsyncadd [#allocation9], 4294965248  ;;  %v1169_v0 = vld [vmem:[#allocation5 + $0x74] ss:$8 sps:$4 sm:$0xff]   ;;  %v1173_v2 = vld [vmem:[#allocation5 + $0x70] ss:$8 sps:$4 sm:$0xff]  }
  0x35   :  { %v1171_v1 = vld [vmem:[#allocation5 + $0x174] ss:$8 sps:$4 sm:$0xff]   ;;  %493 = vmatprep.subr.bf16.mxu0 %v1169_v0  ;;  %v1174_v3 = vld [vmem:[#allocation5 + $0x170] ss:$8 sps:$4 sm:$0xff]   ;;  %v1175_v4 = vld [vmem:[#allocation5 + $0x64] ss:$8 sps:$4 sm:$0xff]  }
  0x36   :  { %534 = vmatprep.subr.bf16.mxu1 %v1171_v1  ;;  %494 = vmatpush1.bf16.msra.mxu0 %v1173_v2  ;;  %v1177_v5 = vld [vmem:[#allocation5 + $0x164] ss:$8 sps:$4 sm:$0xff]   ;;  %v1179_v6 = vld [vmem:[#allocation5 + $0x60] ss:$8 sps:$4 sm:$0xff]   ;;  %v1181_v8 = vld [vmem:[#allocation5 + $0x54] ss:$8 sps:$4 sm:$0xff]  }
  0x37   :  { %535 = vmatpush1.bf16.msra.mxu1 %v1174_v3  ;;  %495 = vmatprep.subr.bf16.mxu0 %v1175_v4  ;;  %v1180_v7 = vld [vmem:[#allocation5 + $0x160] ss:$8 sps:$4 sm:$0xff]   ;;  %v1183_v9 = vld [vmem:[#allocation5 + $0x154] ss:$8 sps:$4 sm:$0xff]   ;;  %v1185_v10 = vld [vmem:[#allocation5 + $0x50] ss:$8 sps:$4 sm:$0xff]  }
  0x38   :  { %536 = vmatprep.subr.bf16.mxu1 %v1177_v5  ;;  %v1186_v11 = vld [vmem:[#allocation5 + $0x150] ss:$8 sps:$4 sm:$0xff]   ;;  %v1187_v12 = vld [vmem:[#allocation5 + $0x44] ss:$8 sps:$4 sm:$0xff]   ;;  %v1191_v14 = vld [vmem:[#allocation5 + $0x40] ss:$8 sps:$4 sm:$0xff]  }
  0x39   :  { %v1189_v13 = vld [vmem:[#allocation5 + $0x144] ss:$8 sps:$4 sm:$0xff]   ;;  %v1192_v15 = vld [vmem:[#allocation5 + $0x140] ss:$8 sps:$4 sm:$0xff]   ;;  %v1193_v16 = vld [vmem:[#allocation5 + $0x34] ss:$8 sps:$4 sm:$0xff]  }
  0x3a   :  { %496 = vmatpush1.bf16.msra.mxu0 %v1179_v6  ;;  %v1195_v17 = vld [vmem:[#allocation5 + $0x134] ss:$8 sps:$4 sm:$0xff]   ;;  %v1197_v18 = vld [vmem:[#allocation5 + $0x30] ss:$8 sps:$4 sm:$0xff]   ;;  %v1199_v20 = vld [vmem:[#allocation5 + $0x24] ss:$8 sps:$4 sm:$0xff]  }
  0x3b   :  { %537 = vmatpush1.bf16.msra.mxu1 %v1180_v7  ;;  %497 = vmatprep.subr.bf16.mxu0 %v1181_v8  ;;  %v1198_v19 = vld [vmem:[#allocation5 + $0x130] ss:$8 sps:$4 sm:$0xff]   ;;  %v1201_v21 = vld [vmem:[#allocation5 + $0x124] ss:$8 sps:$4 sm:$0xff]   ;;  %v1203_v22 = vld [vmem:[#allocation5 + $0x20] ss:$8 sps:$4 sm:$0xff]  }
  0x3c   :  { %538 = vmatprep.subr.bf16.mxu1 %v1183_v9  ;;  %v1204_v23 = vld [vmem:[#allocation5 + $0x120] ss:$8 sps:$4 sm:$0xff]   ;;  %v1205_v24 = vld [vmem:[#allocation5 + $0x14] ss:$8 sps:$4 sm:$0xff]   ;;  %v1209_v26 = vld [vmem:[#allocation5 + $0x10] ss:$8 sps:$4 sm:$0xff]  }
  0x3d   :  { %v1207_v25 = vld [vmem:[#allocation5 + $0x114] ss:$8 sps:$4 sm:$0xff]   ;;  %v1210_v27 = vld [vmem:[#allocation5 + $0x110] ss:$8 sps:$4 sm:$0xff]   ;;  %v1211_v28 = vld [vmem:[#allocation5 + $0x4] ss:$8 sps:$4 sm:$0xff]  }
  0x3e   :  { %498 = vmatpush1.bf16.msra.mxu0 %v1185_v10  ;;  %v1213_v29 = vld [vmem:[#allocation5 + $0x104] ss:$8 sps:$4 sm:$0xff]   ;;  %v1215_v30 = vld [vmem:[#allocation5] ss:$8 sps:$4 sm:$0xff]   ;;  %v1217_v32 = vld [vmem:[#allocation5 + $0xf4] ss:$8 sps:$4 sm:$0xff]  }
  0x3f   :  { %539 = vmatpush1.bf16.msra.mxu1 %v1186_v11  ;;  %499 = vmatprep.subr.bf16.mxu0 %v1187_v12  ;;  %v1216_v31 = vld [vmem:[#allocation5 + $0x100] ss:$8 sps:$4 sm:$0xff]   ;;  %v1219_v33 = vld [vmem:[#allocation5 + $0x1f4] ss:$8 sps:$4 sm:$0xff]   ;;  %v1221_v34 = vld [vmem:[#allocation5 + $0xf0] ss:$8 sps:$4 sm:$0xff]  }
  0x40   :  { %540 = vmatprep.subr.bf16.mxu1 %v1189_v13  ;;  %v1222_v35 = vld [vmem:[#allocation5 + $0x1f0] ss:$8 sps:$4 sm:$0xff]   ;;  %v1223_v36 = vld [vmem:[#allocation5 + $0xe4] ss:$8 sps:$4 sm:$0xff]   ;;  %v1227_v38 = vld [vmem:[#allocation5 + $0xe0] ss:$8 sps:$4 sm:$0xff]  }
  0x41   :  { %v1225_v37 = vld [vmem:[#allocation5 + $0x1e4] ss:$8 sps:$4 sm:$0xff]   ;;  %v1228_v39 = vld [vmem:[#allocation5 + $0x1e0] ss:$8 sps:$4 sm:$0xff]   ;;  %v1229_v40 = vld [vmem:[#allocation5 + $0xd4] ss:$8 sps:$4 sm:$0xff]  }
  0x42   :  { %500 = vmatpush1.bf16.msra.mxu0 %v1191_v14  ;;  %v1231_v41 = vld [vmem:[#allocation5 + $0x1d4] ss:$8 sps:$4 sm:$0xff]   ;;  %v1233_v42 = vld [vmem:[#allocation5 + $0xd0] ss:$8 sps:$4 sm:$0xff]   ;;  %v1235_v44 = vld [vmem:[#allocation5 + $0xc4] ss:$8 sps:$4 sm:$0xff]  }
  0x43   :  { %541 = vmatpush1.bf16.msra.mxu1 %v1192_v15  ;;  %501 = vmatprep.subr.bf16.mxu0 %v1193_v16  ;;  %v1234_v43 = vld [vmem:[#allocation5 + $0x1d0] ss:$8 sps:$4 sm:$0xff]   ;;  %v1237_v45 = vld [vmem:[#allocation5 + $0x1c4] ss:$8 sps:$4 sm:$0xff]   ;;  %v1239_v49 = vld [vmem:[#allocation5 + $0xc0] ss:$8 sps:$4 sm:$0xff]  }
  0x44   :  { %542 = vmatprep.subr.bf16.mxu1 %v1195_v17  ;;  %v81_v46 = vld [vmem:[#allocation2] sm:$0xff]  ;;  %v82_v48 = vld [vmem:[#allocation2 + $0x8] sm:$0xff]  ;;  %v1240_v50 = vld [vmem:[#allocation5 + $0x1c0] ss:$8 sps:$4 sm:$0xff]  }
  0x45   :  { %v1022_v47 = vcombine.high %v81_v46, %v81_v46  ;;  %v1024_v51 = vcombine.high %v82_v48, %v82_v48  ;;  %v1241_v52 = vld [vmem:[#allocation5 + $0xb4] ss:$8 sps:$4 sm:$0xff]   ;;  %v1245_v54 = vld [vmem:[#allocation5 + $0xb0] ss:$8 sps:$4 sm:$0xff]   ;;  %v1247_v56 = vld [vmem:[#allocation5 + $0xa4] ss:$8 sps:$4 sm:$0xff]   ;;  %v1021_v6 = vcombine.low %v81_v46, %v81_v46  ;;  %v1023_v7 = vcombine.low %v82_v48, %v82_v48 }
  0x46   :  { %502 = vmatpush1.bf16.msra.mxu0 %v1197_v18  ;;  %v1243_v53 = vld [vmem:[#allocation5 + $0x1b4] ss:$8 sps:$4 sm:$0xff]   ;;  %v1246_v55 = vld [vmem:[#allocation5 + $0x1b0] ss:$8 sps:$4 sm:$0xff]   ;;  %v1249_v57 = vld [vmem:[#allocation5 + $0x1a4] ss:$8 sps:$4 sm:$0xff]  }
  0x47   :  { %543 = vmatpush1.bf16.msra.mxu1 %v1198_v19  ;;  %503 = vmatprep.subr.bf16.mxu0 %v1199_v20  ;;  %v1251_v58 = vld [vmem:[#allocation5 + $0xa0] ss:$8 sps:$4 sm:$0xff]   ;;  %v1253_v60 = vld [vmem:[#allocation5 + $0x94] ss:$8 sps:$4 sm:$0xff]   ;;  %v1257_v62 = vld [vmem:[#allocation5 + $0x90] ss:$8 sps:$4 sm:$0xff]  }
  0x48   :  { %544 = vmatprep.subr.bf16.mxu1 %v1201_v21  ;;  %525 = vmatprep.mubr.bf16.mxu0 %v1022_v47  ;;  %v1252_v59 = vld [vmem:[#allocation5 + $0x1a0] ss:$8 sps:$4 sm:$0xff]   ;;  %v1255_v61 = vld [vmem:[#allocation5 + $0x194] ss:$8 sps:$4 sm:$0xff]   ;;  %v1258_v63 = vld [vmem:[#allocation5 + $0x190] ss:$8 sps:$4 sm:$0xff]  }
  0x49   :  { %566 = vmatprep.mubr.bf16.mxu1 %v1024_v51  ;;  %v1259_v0 = vld [vmem:[#allocation5 + $0x84] ss:$8 sps:$4 sm:$0xff]   ;;  %v1263_v2 = vld [vmem:[#allocation5 + $0x80] ss:$8 sps:$4 sm:$0xff]   ;;  %v1271_v4 = vld [vmem:[#allocation7 + $0x74] ss:$8 sps:$4 sm:$0xff]  }
  0x4a   :  { %504 = vmatpush1.bf16.msra.mxu0 %v1203_v22  ;;  %v1261_v1 = vld [vmem:[#allocation5 + $0x184] ss:$8 sps:$4 sm:$0xff]   ;;  %v1264_v3 = vld [vmem:[#allocation5 + $0x180] ss:$8 sps:$4 sm:$0xff]   ;;  %v1269_v5 = vld [vmem:[#allocation7 + $0x70] ss:$8 sps:$4 sm:$0xff]  }
  0x4b   :  { %545 = vmatpush1.bf16.msra.mxu1 %v1204_v23  ;;  %505 = vmatprep.subr.bf16.mxu0 %v1205_v24  ;;  %v1274_v8 = vld [vmem:[#allocation7 + $0x64] ss:$8 sps:$4 sm:$0xff]   ;;  %v1272_v9 = vld [vmem:[#allocation7 + $0x60] ss:$8 sps:$4 sm:$0xff]   ;;  %v1277_v10 = vld [vmem:[#allocation7 + $0x54] ss:$8 sps:$4 sm:$0xff]  }
  0x4c   :  { %546 = vmatprep.subr.bf16.mxu1 %v1207_v25  ;;  %v1275_v11 = vld [vmem:[#allocation7 + $0x50] ss:$8 sps:$4 sm:$0xff]   ;;  %v1280_v12 = vld [vmem:[#allocation7 + $0x44] ss:$8 sps:$4 sm:$0xff]   ;;  %v1278_v13 = vld [vmem:[#allocation7 + $0x40] ss:$8 sps:$4 sm:$0xff]  }
  0x4d   :  { %v1283_v14 = vld [vmem:[#allocation7 + $0x34] ss:$8 sps:$4 sm:$0xff]   ;;  %v1281_v15 = vld [vmem:[#allocation7 + $0x30] ss:$8 sps:$4 sm:$0xff]   ;;  %v1286_v16 = vld [vmem:[#allocation7 + $0x24] ss:$8 sps:$4 sm:$0xff]  }
  0x4e   :  { %506 = vmatpush1.bf16.msra.mxu0 %v1209_v26  ;;  %v1284_v17 = vld [vmem:[#allocation7 + $0x20] ss:$8 sps:$4 sm:$0xff]   ;;  %v1289_v18 = vld [vmem:[#allocation7 + $0x14] ss:$8 sps:$4 sm:$0xff]   ;;  %v1287_v19 = vld [vmem:[#allocation7 + $0x10] ss:$8 sps:$4 sm:$0xff]  }
  0x4f   :  { %547 = vmatpush1.bf16.msra.mxu1 %v1210_v27  ;;  %507 = vmatprep.subr.bf16.mxu0 %v1211_v28  ;;  %v1292_v20 = vld [vmem:[#allocation7 + $0x4] ss:$8 sps:$4 sm:$0xff]   ;;  %v1290_v21 = vld [vmem:[#allocation7] ss:$8 sps:$4 sm:$0xff]   ;;  %v1295_v22 = vld [vmem:[#allocation7 + $0xf4] ss:$8 sps:$4 sm:$0xff]  }
  0x50   :  { %548 = vmatprep.subr.bf16.mxu1 %v1213_v29  ;;  %v1293_v23 = vld [vmem:[#allocation7 + $0xf0] ss:$8 sps:$4 sm:$0xff]   ;;  %v1298_v24 = vld [vmem:[#allocation7 + $0xe4] ss:$8 sps:$4 sm:$0xff]   ;;  %v1296_v25 = vld [vmem:[#allocation7 + $0xe0] ss:$8 sps:$4 sm:$0xff]  }
  0x51   :  { %v1301_v26 = vld [vmem:[#allocation7 + $0xd4] ss:$8 sps:$4 sm:$0xff]   ;;  %v1299_v27 = vld [vmem:[#allocation7 + $0xd0] ss:$8 sps:$4 sm:$0xff]   ;;  %v1304_v28 = vld [vmem:[#allocation7 + $0xc4] ss:$8 sps:$4 sm:$0xff]  }
  0x52   :  { %508 = vmatpush1.bf16.msra.mxu0 %v1215_v30  ;;  %v1302_v29 = vld [vmem:[#allocation7 + $0xc0] ss:$8 sps:$4 sm:$0xff]   ;;  %v1307_v30 = vld [vmem:[#allocation7 + $0xb4] ss:$8 sps:$4 sm:$0xff]  }
  0x53   :  { %549 = vmatpush1.bf16.msra.mxu1 %v1216_v31  ;;  %509 = vmatprep.subr.bf16.mxu0 %v1217_v32  ;;  %v1305_v31 = vld [vmem:[#allocation7 + $0xb0] ss:$8 sps:$4 sm:$0xff]   ;;  %v1310_v32 = vld [vmem:[#allocation7 + $0xa4] ss:$8 sps:$4 sm:$0xff]  }
  0x54   :  { %550 = vmatprep.subr.bf16.mxu1 %v1219_v33  ;;  %v1308_v33 = vld [vmem:[#allocation7 + $0xa0] ss:$8 sps:$4 sm:$0xff]   ;;  %v1325_v46 = vld [vmem:[#allocation8 + $0x58] sm:$0xff]   ;;  %v1327_v48 = vld [vmem:[#allocation8 + $0x50] sm:$0xff]  }
  0x55   :  { %v1326_v47 = vld [vmem:[#allocation8 + $0x18] sm:$0xff]  }
  0x56   :  { %510 = vmatpush2.bf16.msra.mxu0 %v1221_v34  ;;  %v1313_v34 = vld [vmem:[#allocation7 + $0x94] ss:$8 sps:$4 sm:$0xff]  }
  0x57   :  { %551 = vmatpush2.bf16.msra.mxu1 %v1222_v35  ;;  %511 = vmatprep.subr.bf16.mxu0 %v1223_v36  ;;  %v1311_v35 = vld [vmem:[#allocation7 + $0x90] ss:$8 sps:$4 sm:$0xff]   ;;  %v1316_v36 = vld [vmem:[#allocation7 + $0x84] ss:$8 sps:$4 sm:$0xff]  }
  0x58   :  { %552 = vmatprep.subr.bf16.mxu1 %v1225_v37  ;;  %v1314_v37 = vld [vmem:[#allocation7 + $0x80] ss:$8 sps:$4 sm:$0xff]  }
  0x5a   :  { %512 = vmatpush2.bf16.msra.mxu0 %v1227_v38  ;;  %v1317_v38 = vld [vmem:[#allocation8 + $0x78] sm:$0xff]  }
  0x5b   :  { %553 = vmatpush2.bf16.msra.mxu1 %v1228_v39  ;;  %513 = vmatprep.subr.bf16.mxu0 %v1229_v40  ;;  %v1318_v39 = vld [vmem:[#allocation8 + $0x38] sm:$0xff]   ;;  %v1319_v40 = vld [vmem:[#allocation8 + $0x70] sm:$0xff]  }
  0x5c   :  { %554 = vmatprep.subr.bf16.mxu1 %v1231_v41  ;;  %v1320_v41 = vld [vmem:[#allocation8 + $0x30] sm:$0xff]  }
  0x5e   :  { %514 = vmatpush2.bf16.msra.mxu0 %v1233_v42  ;;  %v1321_v42 = vld [vmem:[#allocation8 + $0x68] sm:$0xff]  }
  0x5f   :  { %555 = vmatpush2.bf16.msra.mxu1 %v1234_v43  ;;  %515 = vmatprep.subr.bf16.mxu0 %v1235_v44  ;;  %v1322_v43 = vld [vmem:[#allocation8 + $0x28] sm:$0xff]   ;;  %v1323_v44 = vld [vmem:[#allocation8 + $0x60] sm:$0xff]  }
  0x60   :  { %556 = vmatprep.subr.bf16.mxu1 %v1237_v45  ;;  %v1324_v45 = vld [vmem:[#allocation8 + $0x20] sm:$0xff]  }
  0x62   :  { %516 = vmatpush2.bf16.msra.mxu0 %v1239_v49  ;;  %v1328_v49 = vld [vmem:[#allocation8 + $0x10] sm:$0xff]  }
  0x63   :  { %557 = vmatpush2.bf16.msra.mxu1 %v1240_v50  ;;  %517 = vmatprep.subr.bf16.mxu0 %v1241_v52  ;;  %v149_v50 = vlaneseq }
  0x64   :  { %558 = vmatprep.subr.bf16.mxu1 %v1243_v53  ;;  %v147_v53 = vld [vmem:[%s1516_s2] sm:$0x3] }
  0x65   :  { %v150_v51 = vshrl.u32 %v149_v50, 7 }
  0x66   :  { %518 = vmatpush2.bf16.msra.mxu0 %v1245_v54 }
  0x67   :  { %559 = vmatpush2.bf16.msra.mxu1 %v1246_v55  ;;  %519 = vmatprep.subr.bf16.mxu0 %v1247_v56  ;;  %v151_v52 = vsub.s32 0, %v150_v51  ;;  %v155_v54 = vsub.s32 1, %v150_v51 }
  0x68   :  { %560 = vmatprep.subr.bf16.mxu1 %v1249_v57 }
  0x69   :  { %v152_v55 = vrot.slane %v147_v53, %v151_v52  ;;  %v156_v56 = vrot.slane %v147_v53, %v155_v54 }
  0x6a   :  { %520 = vmatpush2.bf16.msra.mxu0 %v1251_v58 }
  0x6b   :  { %561 = vmatpush2.bf16.msra.mxu1 %v1252_v59  ;;  %521 = vmatprep.subr.bf16.mxu0 %v1253_v60 }
  0x6c   :  { %562 = vmatprep.subr.bf16.mxu1 %v1255_v61 }
  0x6e   :  { %522 = vmatpush2.bf16.msra.mxu0 %v1257_v62 }
  0x6f   :  { %563 = vmatpush2.bf16.msra.mxu1 %v1258_v63  ;;  %523 = vmatprep.subr.bf16.mxu0 %v1259_v0 }
  0x70   :  { %564 = vmatprep.subr.bf16.mxu1 %v1261_v1 }
  0x72   :  { %524 = vmatpush2.bf16.msra.mxu0 %v1263_v2 }
  0x73   :  { %565 = vmatpush2.bf16.msra.mxu1 %v1264_v3  ;;  %783 = vmatprep.subr.bf16.mxu0 %v1271_v4 }
  0x74   :  { %1138 = vmatprep.subr.bf16.mxu1 %v1317_v38 }
  0x75   :  { %526 = vmatmul.mubr.bf16.vlgmr.msra.gmra.mxu0 %v1021_v6 }
  0x76   :  { %567 = vmatmul.mubr.bf16.vlgmr.msra.gmra.mxu1 %v1023_v7  ;;  %784 = vmatpush1.bf16.msra.mxu0 %v1269_v5 }
  0x77   :  { %785 = vmatprep.subr.bf16.mxu0 %v1274_v8  ;;  %1139 = vmatpush3.bf16.msra.mxu1 %v1318_v39 }
  0x78   :  { %1140 = vmatprep.subr.bf16.mxu1 %v1319_v40 }
  0x7a   :  { %786 = vmatpush1.bf16.msra.mxu0 %v1272_v9  ;;  %v1329_v9 = vld [vmem:[#allocation8 + $0x48] sm:$0xff]  }
  0x7b   :  { %787 = vmatprep.subr.bf16.mxu0 %v1277_v10  ;;  %1141 = vmatpush3.bf16.msra.mxu1 %v1320_v41  ;;  %v1330_v10 = vld [vmem:[#allocation8 + $0x8] sm:$0xff]  }
  0x7c   :  { %1142 = vmatprep.subr.bf16.mxu1 %v1321_v42 }
  0x7e   :  { %788 = vmatpush1.bf16.msra.mxu0 %v1275_v11  ;;  %v1331_v11 = vld [vmem:[#allocation8 + $0x40] sm:$0xff]  }
  0x7f   :  { %789 = vmatprep.subr.bf16.mxu0 %v1280_v12  ;;  %1143 = vmatpush3.bf16.msra.mxu1 %v1322_v43  ;;  %v1332_v12 = vld [vmem:[#allocation8] sm:$0xff]  }
  0x80   :  { %1144 = vmatprep.subr.bf16.mxu1 %v1323_v44 }
  0x82   :  { %790 = vmatpush1.bf16.msra.mxu0 %v1278_v13  ;;  %v611_v13 = vld [vmem:[%s1518_s4] sm:$0x3]  ;;  %s1449_s4 = smov [#allocation10]  }
  0x83   :  { %791 = vmatprep.subr.bf16.mxu0 %v1283_v14  ;;  %1145 = vmatpush3.bf16.msra.mxu1 %v1324_v45  ;;  %v616_v14 = vrot.slane %v611_v13, %v151_v52  ;;  %s1010_s26 = sshll.u32 %s1449_s4, 4  ;;  %s1011_s26 = int_to_ptr.vmem [resolvable:$true] %s1010_s26 }
  0x84   :  { %1146 = vmatprep.subr.bf16.mxu1 %v1325_v46  ;;  %s1413_s27 = scalar_lea.vmem %s1011_s26, 128  ;;  %p1418_p7 = scmp.lt.s32.totalorder %s1011_s26, %s1011_s26 }
  0x85   :  { %p1414_p6 = scmp.ne.s32.totalorder %s1011_s26, %s1413_s27  ;;  %p1419_p8 = scmp.lt.s32.totalorder %s1413_s27, %s1413_s27 }
  0x86   :  { %792 = vmatpush1.bf16.msra.mxu0 %v1281_v15  ;;  %v620_v15 = vrot.slane %v611_v13, %v155_v54 }
  0x87   :  { %793 = vmatprep.subr.bf16.mxu0 %v1286_v16  ;;  %1147 = vmatpush3.bf16.msra.mxu1 %v1326_v47  ;;  %p1420_p9 = por %p1419_p8, %p1418_p7 }
  0x88   :  { %1148 = vmatprep.subr.bf16.mxu1 %v1327_v48 }
  0x89   :  { %p1421_p10 = pnand %p1420_p9, %p1414_p6 }
  0x8a   :  { %794 = vmatpush1.bf16.msra.mxu0 %v1284_v17 }
  0x8b   :  { %795 = vmatprep.subr.bf16.mxu0 %v1289_v18  ;;  %1149 = vmatpush3.bf16.msra.mxu1 %v1328_v49 }
  0x8c   :  { %1150 = vmatprep.subr.bf16.mxu1 %v1329_v9 }
  0x8e   :  { %796 = vmatpush1.bf16.msra.mxu0 %v1287_v19 }
  0x8f   :  { %797 = vmatprep.subr.bf16.mxu0 %v1292_v20  ;;  %1151 = vmatpush3.bf16.msra.mxu1 %v1330_v10 }
  0x90   :  { %1152 = vmatprep.subr.bf16.mxu1 %v1331_v11 }
  0x92   :  { %798 = vmatpush1.bf16.msra.mxu0 %v1290_v21 }
  0x93   :  { %799 = vmatprep.subr.bf16.mxu0 %v1295_v22  ;;  %1153 = vmatpush3.bf16.msra.mxu1 %v1332_v12 }
  0x96   :  { %800 = vmatpush2.bf16.msra.mxu0 %v1293_v23 }
  0x97   :  { %801 = vmatprep.subr.bf16.mxu0 %v1298_v24 }
  0x9a   :  { %802 = vmatpush2.bf16.msra.mxu0 %v1296_v25 }
  0x9b   :  { %803 = vmatprep.subr.bf16.mxu0 %v1301_v26 }
  0x9e   :  { %804 = vmatpush2.bf16.msra.mxu0 %v1299_v27  ;;  %v1121_v27 = vld [vmem:[%s1520_s6] ss:$0 sm:$0xff] }
  0x9f   :  { %805 = vmatprep.subr.bf16.mxu0 %v1304_v28 }
  0xa2   :  { %806 = vmatpush2.bf16.msra.mxu0 %v1302_v29 }
  0xa3   :  { %807 = vmatprep.subr.bf16.mxu0 %v1307_v30 }
  0xa6   :  { %808 = vmatpush2.bf16.msra.mxu0 %v1305_v31 }
  0xa7   :  { %809 = vmatprep.subr.bf16.mxu0 %v1310_v32 }
  0xaa   :  { %810 = vmatpush2.bf16.msra.mxu0 %v1308_v33 }
  0xab   :  { %811 = vmatprep.subr.bf16.mxu0 %v1313_v34 }
  0xae   :  { %812 = vmatpush2.bf16.msra.mxu0 %v1311_v35 }
  0xaf   :  { %813 = vmatprep.subr.bf16.mxu0 %v1316_v36 }
  0xb2   :  { %814 = vmatpush2.bf16.msra.mxu0 %v1314_v37 }
 0x135   :  { %v527_v57 = vpop.f32.mrf.mxu0 }
 0x136   :  { %v568_v58 = vpop.f32.mrf.mxu1  ;;  %v528_v59 = vadd.f32 %v527_v57, %v152_v55 }
 0x137   :  { %v529_v60 = vpop.f32.mrf.mxu0 }
 0x138   :  { %v570_v61 = vpop.f32.mrf.mxu1  ;;  %v569_v62 = vadd.f32 %v568_v58, %v528_v59  ;;  %v530_v63 = vadd.f32 %v529_v60, %v156_v56 }
 0x139   :  { %v531_v0 = vpop.f32.mrf.mxu0 }
 0x13a   :  { %v572_v1 = vpop.f32.mrf.mxu1  ;;  %v571_v2 = vadd.f32 %v570_v61, %v530_v63  ;;  %v575_v3 = vmax.f32 %v569_v62, 0.0 }
 0x13b   :  { %v532_v4 = vpop.f32.mrf.mxu0 }
 0x13c   :  { %v573_v5 = vpop.f32.mrf.mxu1  ;;  %v576_v6 = vmax.f32 %v571_v2, 0.0  ;;  %v577_v8 = vpack.c.bf16 %v575_v3, %v575_v3 }
 0x13e   :  { %v578_v7 = vpack.c.bf16 %v576_v6, %v576_v6 }
 0x140   :  { %815 = vmatprep.mubr.bf16.mxu0 %v578_v7 }
 0x141   :  { %816 = vmatmul.mubr.bf16.vlgmr.msra.gmra.mxu0 %v577_v8 }
 0x201   :  { %v817_v16 = vpop.f32.mrf.mxu0 }
 0x202   :  { %v818_v17 = vadd.f32 %v817_v16, %v616_v14 }
 0x203   :  { %v819_v18 = vpop.f32.mrf.mxu0 }
 0x204   :  { %v820_v19 = vadd.f32 %v819_v18, %v620_v15  ;;  %v824_v20 = vmax.f32 %v818_v17, 0.0 }
 0x205   :  { %v821_v21 = vpop.f32.mrf.mxu0 }
 0x206   :  { %v825_v22 = vmax.f32 %v820_v19, 0.0  ;;  %v826_v25 = vpack.c.bf16 %v824_v20, %v824_v20 }
 0x207   :  { %v822_v23 = vpop.f32.mrf.mxu0 }
 0x208   :  { %v827_v24 = vpack.c.bf16 %v825_v22, %v825_v22 }
 0x20a   :  { %995 = vmatprep.mubr.bf16.mxu1 %v827_v24 }
 0x20b   :  { %996 = vmatmul.mubr.bf16.vlgmr.msra.gmra.mxu1 %v826_v25 }
 0x2cb   :  { %v1154_v26 = vpop.f32.mrf.mxu1 }
 0x2cd   :  { %v1155_v28 = vpop.f32.mrf.mxu1 }
 0x2ce   :  { %v1156_v29 = vadd.f32 %v1155_v28, %v1154_v26 }
 0x2cf   :  { %v1157_v30 = vpop.f32.mrf.mxu1 }
 0x2d0   :  { %v998_v31 = vadd.f32 %v1156_v29, %v1121_v27 }
 0x2d1   :  { %v1158_v32 = vpop.f32.mrf.mxu1 }
 0x2d2   :  { %1003 = vst [vmem:[#allocation10] sm:$0xff] %v998_v31 }
 0x2d3   :  { %1424 = shalt.err (!%p1421_p10)
}
 0x2d4   :  { %1013 = dma.vmem_to_hbm [thread:$0]  %s1011_s26, 128, %s1521_s7, [#allocation4]  }
 0x2d5   :  { %1439 = dma.done.wait [#allocation4], 128  }
 0x2d6   :  { %1440 = vsyncadd [#allocation4], 4294967168 }
 0x2d7   :  { %1017 = vsyncpa [#allocation3], 1 }
 0x2d8   :  { %1018 = vsyncpa [#allocation6], 1 }
 0x2d9   :  { %1019 = vsyncpa [#allocation9], 1 }
 0x2da   :  { %1020 = vsyncpa [#allocation4], 1 }

</bundles_post_ra>
